<compile_context>
chip_gen: v7x
topology: tpu7x:2x2x1
jax: 0.10.0
libtpu: 0.0.40
codegen_flags: <defaults>
</compile_context>

<pallas_src>
import functools

import jax
import jax.numpy as jnp
import numpy as np
from jax import lax
from jax.experimental import pallas as pl
from jax.experimental.pallas import tpu as pltpu


def _round_up(x, m):
    return ((x + m - 1) // m) * m


def _vmem_limit_bytes():
    # Budget against the physical VMEM of the current generation (64 MiB on
    # v7x, 128 MiB on v5e/v6e), leaving headroom; also raises the default
    # scoped limit (16/32 MiB) so larger tiles are legal.
    try:
        cap = pltpu.get_tpu_info().vmem_capacity_bytes
    except Exception:
        cap = 64 * 1024 * 1024
    return int(min(100 * 1024 * 1024, int(cap * 0.9)))


# --------------------------------------------------------------------------
# Kernel 1: fused QKV projection over batch-flattened rows.
# --------------------------------------------------------------------------
def _qkv_proj_kernel(x_ref, w_ref, o_ref):
    # Single (tm, d_in_p) @ (d_in_p, tn) MXU job; f32 accumulate, bf16 store.
    # The softmax scale is pre-folded into the W_q columns in the wrapper.
    o_ref[...] = jnp.dot(
        x_ref[...], w_ref[...],
        preferred_element_type=jnp.float32).astype(o_ref.dtype)


# --------------------------------------------------------------------------
# Kernel 2: flash attention (online softmax) + fused output projection.
# --------------------------------------------------------------------------
def _flash_attn_kernel(q_ref, k_ref, v_ref, wo_ref, bo_ref, o_ref,
                       m_sc, l_sc, acc_sc, *, causal, n_actual, need_pad,
                       blk_q, blk_k):
    qi = pl.program_id(1)
    ki = pl.program_id(2)
    nk = pl.num_programs(2)
    is_last_kv = ki == nk - 1

    @pl.when(ki == 0)
    def _init():
        m_sc[...] = jnp.full_like(m_sc, -1e30)
        l_sc[...] = jnp.zeros_like(l_sc)
        acc_sc[...] = jnp.zeros_like(acc_sc)

    def _make_update(masked):
        def _update():
            q = q_ref[0]                                  # (blk_q, D_inner_p)
            k = k_ref[0]                                  # (blk_k, D_inner_p)
            v = v_ref[0]
            # q @ k^T with last-dim contraction (no explicit transpose of k).
            s = lax.dot_general(q, k, (((1,), (1,)), ((), ())),
                                preferred_element_type=jnp.float32)
            if masked:
                col = ki * blk_k + lax.broadcasted_iota(
                    jnp.int32, (blk_q, blk_k), 1)
                mask = None
                if need_pad:
                    mask = col >= n_actual                # padded-key mask
                if causal:
                    row = qi * blk_q + lax.broadcasted_iota(
                        jnp.int32, (blk_q, blk_k), 0)
                    cm = col > row
                    mask = cm if mask is None else jnp.logical_or(mask, cm)
                # Large-but-finite mask value: exp underflows to exactly 0,
                # no inf-inf NaNs in the online max update.
                s = jnp.where(mask, -1e30, s)

            m_prev = m_sc[...]
            m_new = jnp.maximum(m_prev, jnp.max(s, axis=-1, keepdims=True))
            alpha = jnp.exp(m_prev - m_new)
            p = jnp.exp(s - m_new)
            l_sc[...] = alpha * l_sc[...] + jnp.sum(p, axis=-1, keepdims=True)
            acc_sc[...] = alpha * acc_sc[...] + jnp.dot(
                p.astype(v.dtype), v, preferred_element_type=jnp.float32)
            m_sc[...] = m_new
        return _update

    if causal:
        first_q_row = qi * blk_q
        last_q_row = first_q_row + (blk_q - 1)
        first_kv_col = ki * blk_k
        last_kv_col = first_kv_col + (blk_k - 1)
        not_skipped = first_kv_col <= last_q_row     # block not fully masked
        needs_mask = last_kv_col > first_q_row       # crosses the diagonal
        if need_pad:
            needs_mask = jnp.logical_or(needs_mask, is_last_kv)
        pl.when(jnp.logical_and(not_skipped,
                                jnp.logical_not(needs_mask)))(_make_update(False))
        pl.when(jnp.logical_and(not_skipped, needs_mask))(_make_update(True))
    else:
        if need_pad:
            pl.when(jnp.logical_not(is_last_kv))(_make_update(False))
            pl.when(is_last_kv)(_make_update(True))
        else:
            _make_update(False)()

    @pl.when(is_last_kv)
    def _finalize():
        # Softmax division once per q block; approx reciprocal runs on the EUP.
        out = acc_sc[...] * pl.reciprocal(l_sc[...], approx=True)
        y = jnp.dot(out.astype(wo_ref.dtype), wo_ref[...],
                    preferred_element_type=jnp.float32)
        o_ref[0] = (y + bo_ref[...]).astype(o_ref.dtype)


# --------------------------------------------------------------------------
# Wrapper
# --------------------------------------------------------------------------
@functools.partial(jax.jit, static_argnames=("causal",))
def attention_forward(x, w_qkv, w_out, b_out, *, causal=False):
    """x: (B, N, dim_in); w_qkv: (dim_in, 3*dim_inner);
       w_out: (dim_inner, dim_out); b_out: (1, dim_out) or (dim_out,)."""
    B, N, d_in = x.shape
    d_inner, d_out = w_out.shape
    scale = float(d_inner) ** -0.5
    out_dtype = x.dtype
    # bf16 q/k/v intermediates: halve HBM traffic and keep the attention
    # matmuls on the native bf16 MXU path (f32 stats/accumulator retained).
    qkv_dtype = jnp.bfloat16

    # ---- pad feature dims to lane-dense multiples of 128 --------------------
    d_in_p = _round_up(d_in, 128)
    d_inner_p = _round_up(d_inner, 128)
    d_out_p = _round_up(d_out, 128)

    # ---- sequence blocking ---------------------------------------------------
    n8 = _round_up(N, 8)
    if n8 <= 512:
        # Small-N fast path: whole (padded) sequence as one Q block and one
        # KV block -> K/V fetched exactly once, no per-step loop overhead.
        n_pad = n8
        blk_q = n8
        blk_k = n8
    else:
        # MXU-native 256-wide Q tiles (v6e/v7x); wider K tiles when the padded
        # length allows, amortizing per-step overhead and K/V re-reads.
        blk_q = 256
        n_pad = _round_up(N, blk_q)
        blk_k = 512 if n_pad % 512 == 0 else 256
    need_pad = (n_pad != N)

    # ---- weights: split, fold scale, pad, re-fuse at 128-aligned columns ----
    w_q = w_qkv[:, :d_inner] * scale
    w_k = w_qkv[:, d_inner:2 * d_inner]
    w_v = w_qkv[:, 2 * d_inner:]

    def pad2(w, r, c):
        return jnp.pad(w, ((0, r - w.shape[0]), (0, c - w.shape[1])))

    w_fused = jnp.concatenate(
        [pad2(w_q, d_in_p, d_inner_p),
         pad2(w_k, d_in_p, d_inner_p),
         pad2(w_v, d_in_p, d_inner_p)], axis=1).astype(x.dtype)
    w_out_p = pad2(w_out, d_inner_p, d_out_p).astype(out_dtype)
    b_out_p = pad2(jnp.reshape(b_out, (1, d_out)), 1, d_out_p).astype(out_dtype)

    x_p = jnp.pad(x, ((0, 0), (0, n_pad - N), (0, d_in_p - d_in)))
    rows = B * n_pad
    x_flat = x_p.reshape(rows, d_in_p)

    n_cols = 3 * d_inner_p
    # Row/column tiles for the batch-flattened projection matmul.
    if rows <= 1024:
        tm = rows
    else:
        tm = 8
        for cand in (1024, 512, 256, 128, 64, 32, 16, 8):
            if rows % cand == 0:
                tm = cand
                break
    tn = n_cols if n_cols <= 2048 else d_inner_p
    # TODO(synk): for very large d_in additionally tile the contraction dim
    # with an f32 accumulator (v7x 64 MiB VMEM budget).

    vmem_limit = _vmem_limit_bytes()

    # ---- Kernel 1: fused QKV projection (batch folded into M) ----------------
    qkv_flat = pl.pallas_call(
        _qkv_proj_kernel,
        out_shape=jax.ShapeDtypeStruct((rows, n_cols), qkv_dtype),
        grid=(rows // tm, n_cols // tn),
        in_specs=[
            pl.BlockSpec((tm, d_in_p), lambda i, j: (i, 0)),
            pl.BlockSpec((d_in_p, tn), lambda i, j: (0, j)),
        ],
        out_specs=pl.BlockSpec((tm, tn), lambda i, j: (i, j)),
        compiler_params=pltpu.CompilerParams(
            dimension_semantics=("parallel", "parallel"),
            vmem_limit_bytes=vmem_limit),
    )(x_flat, w_fused)

    qkv = qkv_flat.reshape(B, n_pad, n_cols)

    # ---- Kernel 2: flash attention + fused output projection -----------------
    # The fused qkv tensor is passed three times; each BlockSpec selects the
    # q / k / v 128-aligned column band via the last block index (0 / 1 / 2).
    q_idx = lambda b, i, j: (b, i, 0)
    if causal:
        # Clamp K/V block indices to the diagonal so fully-above-diagonal
        # (skipped) blocks re-reference the previous block -> no extra DMA.
        def k_idx(b, i, j):
            return (b, jnp.minimum(j, (i * blk_q + blk_q - 1) // blk_k), 1)

        def v_idx(b, i, j):
            return (b, jnp.minimum(j, (i * blk_q + blk_q - 1) // blk_k), 2)
    else:
        k_idx = lambda b, i, j: (b, j, 1)
        v_idx = lambda b, i, j: (b, j, 2)

    flash_kernel = functools.partial(
        _flash_attn_kernel, causal=causal, n_actual=N, need_pad=need_pad,
        blk_q=blk_q, blk_k=blk_k)

    y_p = pl.pallas_call(
        flash_kernel,
        out_shape=jax.ShapeDtypeStruct((B, n_pad, d_out_p), out_dtype),
        grid=(B, n_pad // blk_q, n_pad // blk_k),
        in_specs=[
            pl.BlockSpec((1, blk_q, d_inner_p), q_idx),
            pl.BlockSpec((1, blk_k, d_inner_p), k_idx),
            pl.BlockSpec((1, blk_k, d_inner_p), v_idx),
            pl.BlockSpec((d_inner_p, d_out_p), lambda b, i, j: (0, 0)),
            pl.BlockSpec((1, d_out_p), lambda b, i, j: (0, 0)),
        ],
        out_specs=pl.BlockSpec((1, blk_q, d_out_p), lambda b, i, j: (b, i, 0)),
        scratch_shapes=[
            pltpu.VMEM((blk_q, 1), jnp.float32),           # running max
            pltpu.VMEM((blk_q, 1), jnp.float32),           # running denominator
            pltpu.VMEM((blk_q, d_inner_p), jnp.float32),   # running accumulator
        ],
        compiler_params=pltpu.CompilerParams(
            dimension_semantics=("parallel", "parallel", "arbitrary"),
            vmem_limit_bytes=vmem_limit),
    )(qkv, qkv, qkv, w_out_p, b_out_p)

    return y_p[:, :N, :d_out]


# --------------------------------------------------------------------------
# Pure-JAX reference mirroring the PyTorch forward.
# --------------------------------------------------------------------------
def attention_reference(x, w_qkv, w_out, b_out, *, causal=False):
    d_inner = w_out.shape[0]
    scale = float(d_inner) ** -0.5
    qkv = x @ w_qkv
    q, k, v = jnp.split(qkv, 3, axis=-1)
    sim = jnp.einsum('bid,bjd->bij', q, k) * scale
    if causal:
        n = sim.shape[-1]
        mask = jnp.triu(jnp.ones((n, n), bool), 1)
        sim = jnp.where(mask[None], -jnp.finfo(sim.dtype).max, sim)
    attn = jax.nn.softmax(sim, axis=-1)
    out = jnp.einsum('bij,bjd->bid', attn, v)
    return out @ w_out + jnp.reshape(b_out, (1, -1))


if __name__ == "__main__":
    ok = True
    max_err = 0.0

    def check(B, N, dim_in, dim_inner, dim_out):
        global ok, max_err
        key = jax.random.PRNGKey(0)
        k_x, k_qkv, k_out, k_b = jax.random.split(key, 4)
        x = jax.random.normal(k_x, (B, N, dim_in), dtype=jnp.float32)
        w_qkv = jax.random.normal(k_qkv, (dim_in, 3 * dim_inner),
                                  jnp.float32) * 0.1
        w_out = jax.random.normal(k_out, (dim_inner, dim_out),
                                  jnp.float32) * 0.1
        b_out = jax.random.normal(k_b, (1, dim_out), jnp.float32) * 0.1
        for causal in (False, True):
            y = jax.block_until_ready(
                attention_forward(x, w_qkv, w_out, b_out, causal=causal))
            y_ref = attention_reference(x, w_qkv, w_out, b_out, causal=causal)
            err = float(jnp.max(jnp.abs(y - y_ref)))
            max_err = max(max_err, err)
            # bf16 q/k/v intermediates + approx reciprocal -> loosened tolerance.
            if not np.allclose(np.asarray(y), np.asarray(y_ref),
                               atol=2e-2, rtol=2e-2):
                ok = False

    # Toy sizes matching the module (single-block fast path).
    check(B=2, N=8, dim_in=16, dim_inner=32, dim_out=16)
    # Padded sequence (padded-key masking) on the single-block path.
    check(B=1, N=197, dim_in=48, dim_inner=64, dim_out=24)
    # Multi-block flash tiling + causal block skipping / index-map clamping.
    check(B=1, N=600, dim_in=32, dim_inner=64, dim_out=32)

    if ok:
        print("KERNEL_OK")
    else:
        print("MISMATCH max_abs_err=%.3e" % max_err)
</pallas_src>

<mosaic_0001>
module attributes {stable_mosaic.version = 11 : i64} {
  func.func @_qkv_proj_kernel(%arg0: i32, %arg1: i32, %arg2: memref<16x128xf32, #tpu.memory_space<vmem>>, %arg3: memref<128x384xf32, #tpu.memory_space<vmem>>, %arg4: memref<16x384xbf16, #tpu.memory_space<vmem>>) attributes {dimension_semantics = [#tpu.dimension_semantics<parallel>, #tpu.dimension_semantics<parallel>], iteration_bounds = array<i64: 1, 1>, scalar_prefetch = 0 : i64, scratch_operands = 0 : i64, tpu.core_type = #tpu.core_type<tc>, window_params = [{transform_indices = @transform_0, window_bounds = array<i64: 16, 128>}, {transform_indices = @transform_1, window_bounds = array<i64: 128, 384>}, {transform_indices = @transform_2, window_bounds = array<i64: 16, 384>}]} {
    %c0 = arith.constant 0 : index
    %c0_0 = arith.constant 0 : index
    %0 = vector.load %arg2[%c0, %c0_0] : memref<16x128xf32, #tpu.memory_space<vmem>>, vector<16x128xf32>
    %c0_1 = arith.constant 0 : index
    %c0_2 = arith.constant 0 : index
    %1 = vector.load %arg3[%c0_1, %c0_2] : memref<128x384xf32, #tpu.memory_space<vmem>>, vector<128x384xf32>
    %cst = arith.constant dense<0.000000e+00> : vector<16x384xf32>
    %2 = tpu.matmul %0, %1, %cst {dimension_numbers = #tpu.dot_dimension_numbers<[1], [0], [0], [1], [0, 0, 1, 1], [], []>} : vector<16x128xf32>, vector<128x384xf32>, vector<16x384xf32> -> vector<16x384xf32>
    %3 = arith.truncf %2 : vector<16x384xf32> to vector<16x384xbf16>
    %c0_3 = arith.constant 0 : index
    %c0_4 = arith.constant 0 : index
    %4 = vector.load %arg4[%c0_3, %c0_4] : memref<16x384xbf16, #tpu.memory_space<vmem>>, vector<16x384xbf16>
    tpu.vector_store %arg4[%c0_3, %c0_4], %3 {strides = array<i32>} : memref<16x384xbf16, #tpu.memory_space<vmem>>, vector<16x384xbf16>,
    return
  }
  func.func @transform_0(%arg0: i32, %arg1: i32) -> (i32, i32) {
    %c0_i32 = arith.constant 0 : i32
    %c0_i32_0 = arith.constant 0 : i32
    return %arg0, %c0_i32 : i32, i32
  }
  func.func @transform_1(%arg0: i32, %arg1: i32) -> (i32, i32) {
    %c0_i32 = arith.constant 0 : i32
    %c0_i32_0 = arith.constant 0 : i32
    return %c0_i32, %arg1 : i32, i32
  }
  func.func @transform_2(%arg0: i32, %arg1: i32) -> (i32, i32) {
    %c0_i32 = arith.constant 0 : i32
    return %arg0, %arg1 : i32, i32
  }
}

module attributes {stable_mosaic.version = 11 : i64} {
  func.func @_flash_attn_kernel(%arg0: i32, %arg1: i32, %arg2: i32, %arg3: memref<1x8x128xbf16, #tpu.memory_space<vmem>>, %arg4: memref<1x8x128xbf16, #tpu.memory_space<vmem>>, %arg5: memref<1x8x128xbf16, #tpu.memory_space<vmem>>, %arg6: memref<128x128xf32, #tpu.memory_space<vmem>>, %arg7: memref<1x128xf32, #tpu.memory_space<vmem>>, %arg8: memref<1x8x128xf32, #tpu.memory_space<vmem>>, %arg9: memref<8x1xf32, #tpu.memory_space<vmem>>, %arg10: memref<8x1xf32, #tpu.memory_space<vmem>>, %arg11: memref<8x128xf32, #tpu.memory_space<vmem>>) attributes {dimension_semantics = [#tpu.dimension_semantics<parallel>, #tpu.dimension_semantics<parallel>, #tpu.dimension_semantics<arbitrary>], iteration_bounds = array<i64: 2, 1, 1>, scalar_prefetch = 0 : i64, scratch_operands = 3 : i64, tpu.core_type = #tpu.core_type<tc>, window_params = [{transform_indices = @transform_0, window_bounds = array<i64: 1, 8, 128>}, {transform_indices = @transform_1, window_bounds = array<i64: 1, 8, 128>}, {transform_indices = @transform_2, window_bounds = array<i64: 1, 8, 128>}, {pipeline_mode = #tpu.pipeline_mode<synchronous>, transform_indices = @transform_3, window_bounds = array<i64: 128, 128>}, {pipeline_mode = #tpu.pipeline_mode<synchronous>, transform_indices = @transform_4, window_bounds = array<i64: 1, 128>}, {transform_indices = @transform_5, window_bounds = array<i64: 1, 8, 128>}]} {
    %c0_i32 = arith.constant 0 : i32
    %0 = arith.cmpi eq, %arg2, %c0_i32 : i32
    %c0_i32_0 = arith.constant 0 : i32
    %1 = arith.cmpi eq, %arg2, %c0_i32_0 : i32
    %2 = arith.extui %1 : i1 to i32
    %c0_i32_1 = arith.constant 0 : i32
    %3 = arith.cmpi ne, %2, %c0_i32_1 : i32
    scf.if %3 {
      %cst_26 = arith.constant -1.000000e+30 : f32
      %36 = vector.broadcast %cst_26 : f32 to vector<8x1xf32>
      %c0_27 = arith.constant 0 : index
      %c0_28 = arith.constant 0 : index
      %37 = vector.load %arg9[%c0_27, %c0_28] : memref<8x1xf32, #tpu.memory_space<vmem>>, vector<8x1xf32>
      tpu.vector_store %arg9[%c0_27, %c0_28], %36 {strides = array<i32>} : memref<8x1xf32, #tpu.memory_space<vmem>>, vector<8x1xf32>,
      %cst_29 = arith.constant 0.000000e+00 : f32
      %38 = vector.broadcast %cst_29 : f32 to vector<8x1xf32>
      %c0_30 = arith.constant 0 : index
      %c0_31 = arith.constant 0 : index
      %39 = vector.load %arg10[%c0_30, %c0_31] : memref<8x1xf32, #tpu.memory_space<vmem>>, vector<8x1xf32>
      tpu.vector_store %arg10[%c0_30, %c0_31], %38 {strides = array<i32>} : memref<8x1xf32, #tpu.memory_space<vmem>>, vector<8x1xf32>,
      %cst_32 = arith.constant 0.000000e+00 : f32
      %40 = vector.broadcast %cst_32 : f32 to vector<8x128xf32>
      %c0_33 = arith.constant 0 : index
      %c0_34 = arith.constant 0 : index
      %41 = vector.load %arg11[%c0_33, %c0_34] : memref<8x128xf32, #tpu.memory_space<vmem>>, vector<8x128xf32>
      tpu.vector_store %arg11[%c0_33, %c0_34], %40 {strides = array<i32>} : memref<8x128xf32, #tpu.memory_space<vmem>>, vector<8x128xf32>,
    } else {
    }
    %c0 = arith.constant 0 : index
    %c0_2 = arith.constant 0 : index
    %c0_3 = arith.constant 0 : index
    %4 = vector.load %arg3[%c0, %c0_2, %c0_3] : memref<1x8x128xbf16, #tpu.memory_space<vmem>>, vector<1x8x128xbf16>
    %5 = vector.shape_cast %4 : vector<1x8x128xbf16> to vector<8x128xbf16>
    %c0_4 = arith.constant 0 : index
    %c0_5 = arith.constant 0 : index
    %c0_6 = arith.constant 0 : index
    %6 = vector.load %arg4[%c0_4, %c0_5, %c0_6] : memref<1x8x128xbf16, #tpu.memory_space<vmem>>, vector<1x8x128xbf16>
    %7 = vector.shape_cast %6 : vector<1x8x128xbf16> to vector<8x128xbf16>
    %c0_7 = arith.constant 0 : index
    %c0_8 = arith.constant 0 : index
    %c0_9 = arith.constant 0 : index
    %8 = vector.load %arg5[%c0_7, %c0_8, %c0_9] : memref<1x8x128xbf16, #tpu.memory_space<vmem>>, vector<1x8x128xbf16>
    %9 = vector.shape_cast %8 : vector<1x8x128xbf16> to vector<8x128xbf16>
    %cst = arith.constant dense<0.000000e+00> : vector<8x8xf32>
    %10 = tpu.matmul %5, %7, %cst {dimension_numbers = #tpu.dot_dimension_numbers<[1], [1], [0], [0], [0, 0, 1, 0], [], []>} : vector<8x128xbf16>, vector<8x128xbf16>, vector<8x8xf32> -> vector<8x8xf32>
    %c0_10 = arith.constant 0 : index
    %c0_11 = arith.constant 0 : index
    %11 = vector.load %arg9[%c0_10, %c0_11] : memref<8x1xf32, #tpu.memory_space<vmem>>, vector<8x1xf32>
    %cst_12 = arith.constant dense<0xFF800000> : vector<8xf32>
    %12 = vector.multi_reduction <maximumf>, %10, %cst_12 [1] : vector<8x8xf32> to vector<8xf32>
    %13 = vector.shape_cast %12 : vector<8xf32> to vector<8x1xf32>
    %14 = arith.maximumf %11, %13 : vector<8x1xf32>
    %15 = arith.subf %11, %14 : vector<8x1xf32>
    %16 = math.exp %15 : vector<8x1xf32>
    %17 = vector.broadcast %14 : vector<8x1xf32> to vector<8x8xf32>
    %18 = arith.subf %10, %17 : vector<8x8xf32>
    %19 = math.exp %18 : vector<8x8xf32>
    %c0_13 = arith.constant 0 : index
    %c0_14 = arith.constant 0 : index
    %20 = vector.load %arg10[%c0_13, %c0_14] : memref<8x1xf32, #tpu.memory_space<vmem>>, vector<8x1xf32>
    %21 = arith.mulf %16, %20 : vector<8x1xf32>
    %cst_15 = arith.constant dense<0.000000e+00> : vector<8xf32>
    %22 = vector.multi_reduction <add>, %19, %cst_15 [1] : vector<8x8xf32> to vector<8xf32>
    %23 = vector.shape_cast %22 : vector<8xf32> to vector<8x1xf32>
    %24 = arith.addf %21, %23 : vector<8x1xf32>
    %c0_16 = arith.constant 0 : index
    %c0_17 = arith.constant 0 : index
    %25 = vector.load %arg10[%c0_16, %c0_17] : memref<8x1xf32, #tpu.memory_space<vmem>>, vector<8x1xf32>
    tpu.vector_store %arg10[%c0_16, %c0_17], %24 {strides = array<i32>} : memref<8x1xf32, #tpu.memory_space<vmem>>, vector<8x1xf32>,
    %c0_18 = arith.constant 0 : index
    %c0_19 = arith.constant 0 : index
    %26 = vector.load %arg11[%c0_18, %c0_19] : memref<8x128xf32, #tpu.memory_space<vmem>>, vector<8x128xf32>
    %27 = vector.broadcast %16 : vector<8x1xf32> to vector<8x128xf32>
    %28 = arith.mulf %27, %26 : vector<8x128xf32>
    %29 = arith.truncf %19 : vector<8x8xf32> to vector<8x8xbf16>
    %cst_20 = arith.constant dense<0.000000e+00> : vector<8x128xf32>
    %30 = tpu.matmul %29, %9, %cst_20 {dimension_numbers = #tpu.dot_dimension_numbers<[1], [0], [0], [1], [0, 0, 1, 1], [], []>} : vector<8x8xbf16>, vector<8x128xbf16>, vector<8x128xf32> -> vector<8x128xf32>
    %31 = arith.addf %28, %30 : vector<8x128xf32>
    %c0_21 = arith.constant 0 : index
    %c0_22 = arith.constant 0 : index
    %32 = vector.load %arg11[%c0_21, %c0_22] : memref<8x128xf32, #tpu.memory_space<vmem>>, vector<8x128xf32>
    tpu.vector_store %arg11[%c0_21, %c0_22], %31 {strides = array<i32>} : memref<8x128xf32, #tpu.memory_space<vmem>>, vector<8x128xf32>,
    %c0_23 = arith.constant 0 : index
    %c0_24 = arith.constant 0 : index
    %33 = vector.load %arg9[%c0_23, %c0_24] : memref<8x1xf32, #tpu.memory_space<vmem>>, vector<8x1xf32>
    tpu.vector_store %arg9[%c0_23, %c0_24], %14 {strides = array<i32>} : memref<8x1xf32, #tpu.memory_space<vmem>>, vector<8x1xf32>,
    %34 = arith.extui %0 : i1 to i32
    %c0_i32_25 = arith.constant 0 : i32
    %35 = arith.cmpi ne, %34, %c0_i32_25 : i32
    scf.if %35 {
      %c0_26 = arith.constant 0 : index
      %c0_27 = arith.constant 0 : index
      %36 = vector.load %arg11[%c0_26, %c0_27] : memref<8x128xf32, #tpu.memory_space<vmem>>, vector<8x128xf32>
      %c0_28 = arith.constant 0 : index
      %c0_29 = arith.constant 0 : index
      %37 = vector.load %arg10[%c0_28, %c0_29] : memref<8x1xf32, #tpu.memory_space<vmem>>, vector<8x1xf32>
      %38 = tpu.reciprocal %37 {approx = true} : vector<8x1xf32> -> vector<8x1xf32>
      %39 = vector.broadcast %38 : vector<8x1xf32> to vector<8x128xf32>
      %40 = arith.mulf %36, %39 : vector<8x128xf32>
      %c0_30 = arith.constant 0 : index
      %c0_31 = arith.constant 0 : index
      %41 = vector.load %arg6[%c0_30, %c0_31] : memref<128x128xf32, #tpu.memory_space<vmem>>, vector<128x128xf32>
      %cst_32 = arith.constant dense<0.000000e+00> : vector<8x128xf32>
      %42 = tpu.matmul %40, %41, %cst_32 {dimension_numbers = #tpu.dot_dimension_numbers<[1], [0], [0], [1], [0, 0, 1, 1], [], []>} : vector<8x128xf32>, vector<128x128xf32>, vector<8x128xf32> -> vector<8x128xf32>
      %c0_33 = arith.constant 0 : index
      %c0_34 = arith.constant 0 : index
      %43 = vector.load %arg7[%c0_33, %c0_34] : memref<1x128xf32, #tpu.memory_space<vmem>>, vector<1x128xf32>
      %44 = vector.broadcast %43 : vector<1x128xf32> to vector<8x128xf32>
      %45 = arith.addf %42, %44 : vector<8x128xf32>
      %c0_35 = arith.constant 0 : index
      %c0_36 = arith.constant 0 : index
      %c0_37 = arith.constant 0 : index
      %46 = vector.load %arg8[%c0_35, %c0_36, %c0_37] : memref<1x8x128xf32, #tpu.memory_space<vmem>>, vector<1x8x128xf32>
      %47 = vector.shape_cast %46 : vector<1x8x128xf32> to vector<8x128xf32>
      %48 = vector.shape_cast %45 : vector<8x128xf32> to vector<1x8x128xf32>
      tpu.vector_store %arg8[%c0_35, %c0_36, %c0_37], %48 {strides = array<i32>} : memref<1x8x128xf32, #tpu.memory_space<vmem>>, vector<1x8x128xf32>,
    } else {
    }
    return
  }
  func.func @transform_0(%arg0: i32, %arg1: i32, %arg2: i32) -> (i32, i32, i32) {
    %c0_i32 = arith.constant 0 : i32
    %c0_i32_0 = arith.constant 0 : i32
    return %arg0, %arg1, %c0_i32 : i32, i32, i32
  }
  func.func @transform_1(%arg0: i32, %arg1: i32, %arg2: i32) -> (i32, i32, i32) {
    %c1_i32 = arith.constant 1 : i32
    %c0_i32 = arith.constant 0 : i32
    return %arg0, %arg2, %c1_i32 : i32, i32, i32
  }
  func.func @transform_2(%arg0: i32, %arg1: i32, %arg2: i32) -> (i32, i32, i32) {
    %c2_i32 = arith.constant 2 : i32
    %c0_i32 = arith.constant 0 : i32
    return %arg0, %arg2, %c2_i32 : i32, i32, i32
  }
  func.func @transform_3(%arg0: i32, %arg1: i32, %arg2: i32) -> (i32, i32) {
    %c0_i32 = arith.constant 0 : i32
    %c0_i32_0 = arith.constant 0 : i32
    %c0_i32_1 = arith.constant 0 : i32
    return %c0_i32, %c0_i32_0 : i32, i32
  }
  func.func @transform_4(%arg0: i32, %arg1: i32, %arg2: i32) -> (i32, i32) {
    %c0_i32 = arith.constant 0 : i32
    %c0_i32_0 = arith.constant 0 : i32
    %c0_i32_1 = arith.constant 0 : i32
    return %c0_i32, %c0_i32_0 : i32, i32
  }
  func.func @transform_5(%arg0: i32, %arg1: i32, %arg2: i32) -> (i32, i32, i32) {
    %c0_i32 = arith.constant 0 : i32
    %c0_i32_0 = arith.constant 0 : i32
    return %arg0, %arg1, %c0_i32 : i32, i32, i32
  }
}

</mosaic_0001>

<bundles_post_ra>
// kernel: attention_forward.2
= control target key start
LH: loop header
LB: loop body
LE: loop exit
PB: predicated region body
PF: predicated region fallthrough
CT: control target
= control target key end

     0   :  { %v367_v3 = vmov 0.0   ;;  %s547_s1 = inlined_call_operand.vmem [shape: f32[128,384], index: 1, kind: input, shape index: {}]   ;;  %s548_s0 = inlined_call_operand.vmem [shape: f32[16,128], index: 0, kind: input, shape index: {}]   ;;  %s549_s2 = inlined_call_operand.vmem [shape: bf16[16,384], index: 2, kind: output, shape index: {}]  }
   0x1   :  { %v14_v0 = vld [vmem:[%s547_s1 + $0x8] sm:$0xff]  ;;  %v17_v1 = vld [vmem:[%s547_s1 + $0x20] sm:$0xff]  ;;  %125 = vmatprep.mubr.f32.mxu0 %v367_v3  ;;  %v16_v5 = vld [vmem:[%s547_s1 + $0x18] sm:$0xff] }
   0x2   :  { %v13_v2 = vld [vmem:[%s547_s1] sm:$0xff]  ;;  %v302_v4 = vpack.c.bf16 %v17_v1, %v14_v0  ;;  %v15_v6 = vld [vmem:[%s547_s1 + $0x10] sm:$0xff]  ;;  %v18_v7 = vld [vmem:[%s547_s1 + $0x28] sm:$0xff] }
   0x3   :  { %v304_v8 = vpack.c.bf16 %v16_v5, %v13_v2  ;;  %v334_v9 = vpack.c.bf16 %v18_v7, %v15_v6  ;;  %v20_v10 = vld [vmem:[%s547_s1 + $0x38] sm:$0xff]  ;;  %v23_v11 = vld [vmem:[%s547_s1 + $0x50] sm:$0xff]  ;;  %v22_v14 = vld [vmem:[%s547_s1 + $0x48] sm:$0xff] }
   0x4   :  { %v19_v12 = vld [vmem:[%s547_s1 + $0x30] sm:$0xff]  ;;  %303 = vmatprep.subr.bf16.mxu0 %v302_v4  ;;  %v306_v13 = vpack.c.bf16 %v23_v11, %v20_v10  ;;  %v21_v15 = vld [vmem:[%s547_s1 + $0x40] sm:$0xff]  ;;  %v24_v16 = vld [vmem:[%s547_s1 + $0x58] sm:$0xff] }
   0x5   :  { %305 = vmatpush1.bf16.msra.mxu0 %v304_v8  ;;  %335 = vmatprep.subr.bf16.mxu1 %v334_v9  ;;  %v308_v17 = vpack.c.bf16 %v22_v14, %v19_v12  ;;  %v338_v18 = vpack.c.bf16 %v24_v16, %v21_v15  ;;  %v26_v19 = vld [vmem:[%s547_s1 + $0x68] sm:$0xff]  ;;  %v29_v20 = vld [vmem:[%s547_s1 + $0x80] sm:$0xff]  ;;  %v28_v23 = vld [vmem:[%s547_s1 + $0x78] sm:$0xff] }
   0x6   :  { %v25_v21 = vld [vmem:[%s547_s1 + $0x60] sm:$0xff]  ;;  %307 = vmatprep.subr.bf16.mxu0 %v306_v13  ;;  %337 = vmatpush3.bf16.msra.mxu1 %v334_v9  ;;  %v310_v22 = vpack.c.bf16 %v29_v20, %v26_v19  ;;  %v27_v24 = vld [vmem:[%s547_s1 + $0x70] sm:$0xff]  ;;  %v30_v25 = vld [vmem:[%s547_s1 + $0x88] sm:$0xff] }
   0x7   :  { %339 = vmatprep.subr.bf16.mxu1 %v338_v18  ;;  %v342_v26 = vpack.c.bf16 %v30_v25, %v27_v24  ;;  %v32_v27 = vld [vmem:[%s547_s1 + $0x98] sm:$0xff]  ;;  %v35_v28 = vld [vmem:[%s547_s1 + $0xb0] sm:$0xff]  ;;  %v33_v29 = vld [vmem:[%s547_s1 + $0xa0] sm:$0xff]  ;;  %v312_v31 = vpack.c.bf16 %v28_v23, %v25_v21 }
   0x8   :  { %v36_v30 = vld [vmem:[%s547_s1 + $0xb8] sm:$0xff]  ;;  %v314_v32 = vpack.c.bf16 %v35_v28, %v32_v27  ;;  %v31_v33 = vld [vmem:[%s547_s1 + $0x90] sm:$0xff]  ;;  %v34_v34 = vld [vmem:[%s547_s1 + $0xa8] sm:$0xff] }
   0x9   :  { %309 = vmatpush1.bf16.msra.mxu0 %v308_v17  ;;  %v346_v35 = vpack.c.bf16 %v36_v30, %v33_v29  ;;  %v38_v36 = vld [vmem:[%s547_s1 + $0xc8] sm:$0xff]  ;;  %v41_v37 = vld [vmem:[%s547_s1 + $0xe0] sm:$0xff]  ;;  %v39_v38 = vld [vmem:[%s547_s1 + $0xd0] sm:$0xff]  ;;  %v316_v40 = vpack.c.bf16 %v34_v34, %v31_v33 }
   0xa   :  { %311 = vmatprep.subr.bf16.mxu0 %v310_v22  ;;  %341 = vmatpush3.bf16.msra.mxu1 %v338_v18  ;;  %v42_v39 = vld [vmem:[%s547_s1 + $0xe8] sm:$0xff]  ;;  %v318_v41 = vpack.c.bf16 %v41_v37, %v38_v36  ;;  %v37_v42 = vld [vmem:[%s547_s1 + $0xc0] sm:$0xff]  ;;  %v40_v43 = vld [vmem:[%s547_s1 + $0xd8] sm:$0xff] }
   0xb   :  { %343 = vmatprep.subr.bf16.mxu1 %v342_v26  ;;  %v350_v44 = vpack.c.bf16 %v42_v39, %v39_v38  ;;  %v44_v45 = vld [vmem:[%s547_s1 + $0xf8] sm:$0xff]  ;;  %v47_v46 = vld [vmem:[%s547_s1 + $0x110] sm:$0xff]  ;;  %v45_v47 = vld [vmem:[%s547_s1 + $0x100] sm:$0xff]  ;;  %v320_v49 = vpack.c.bf16 %v40_v43, %v37_v42 }
   0xc   :  { %v48_v48 = vld [vmem:[%s547_s1 + $0x118] sm:$0xff]  ;;  %v322_v50 = vpack.c.bf16 %v47_v46, %v44_v45  ;;  %v43_v51 = vld [vmem:[%s547_s1 + $0xf0] sm:$0xff]  ;;  %v46_v52 = vld [vmem:[%s547_s1 + $0x108] sm:$0xff] }
   0xd   :  { %313 = vmatpush1.bf16.msra.mxu0 %v312_v31  ;;  %v11_v53 = vld [vmem:[%s548_s0] sm:$0xff]  ;;  %v354_v54 = vpack.c.bf16 %v48_v48, %v45_v47  ;;  %v50_v55 = vld [vmem:[%s547_s1 + $0x128] sm:$0xff]  ;;  %v51_v57 = vld [vmem:[%s547_s1 + $0x130] sm:$0xff]  ;;  %v324_v59 = vpack.c.bf16 %v46_v52, %v43_v51 }
   0xe   :  { %315 = vmatprep.subr.bf16.mxu0 %v314_v32  ;;  %345 = vmatpush3.bf16.msra.mxu1 %v342_v26  ;;  %v53_v56 = vld [vmem:[%s547_s1 + $0x140] sm:$0xff]  ;;  %v54_v58 = vld [vmem:[%s547_s1 + $0x148] sm:$0xff]  ;;  %v52_v62 = vld [vmem:[%s547_s1 + $0x138] sm:$0xff] }
   0xf   :  { %347 = vmatprep.subr.bf16.mxu1 %v346_v35  ;;  %299 = vmatprep.mubr.f32.mxu1 %v11_v53  ;;  %v326_v60 = vpack.c.bf16 %v53_v56, %v50_v55  ;;  %v49_v61 = vld [vmem:[%s547_s1 + $0x120] sm:$0xff]  ;;  %v358_v63 = vpack.c.bf16 %v54_v58, %v51_v57  ;;  %v56_v0 = vld [vmem:[%s547_s1 + $0x158] sm:$0xff]  ;;  %v59_v1 = vld [vmem:[%s547_s1 + $0x170] sm:$0xff] }
  0x10   :  { %v57_v2 = vld [vmem:[%s547_s1 + $0x160] sm:$0xff]  ;;  %v60_v4 = vld [vmem:[%s547_s1 + $0x178] sm:$0xff]  ;;  %v328_v5 = vpack.c.bf16 %v52_v62, %v49_v61  ;;  %v330_v6 = vpack.c.bf16 %v59_v1, %v56_v0  ;;  %v55_v7 = vld [vmem:[%s547_s1 + $0x150] sm:$0xff] }
  0x11   :  { %317 = vmatpush1.bf16.msra.mxu0 %v316_v40  ;;  %v58_v8 = vld [vmem:[%s547_s1 + $0x168] sm:$0xff]  ;;  %v362_v9 = vpack.c.bf16 %v60_v4, %v57_v2 }
  0x12   :  { %319 = vmatprep.subr.bf16.mxu0 %v318_v41  ;;  %349 = vmatpush3.bf16.msra.mxu1 %v346_v35  ;;  %v332_v10 = vpack.c.bf16 %v58_v8, %v55_v7  ;;  %v12_v11 = vld [vmem:[%s548_s0 + $0x8] sm:$0xff] }
  0x13   :  { %351 = vmatprep.subr.bf16.mxu1 %v350_v44 }
  0x15   :  { %321 = vmatpush1.bf16.msra.mxu0 %v320_v49 }
  0x16   :  { %323 = vmatprep.subr.bf16.mxu0 %v322_v50  ;;  %353 = vmatpush3.bf16.msra.mxu1 %v350_v44 }
  0x17   :  { %355 = vmatprep.subr.bf16.mxu1 %v354_v54 }
  0x19   :  { %325 = vmatpush1.bf16.msra.mxu0 %v324_v59 }
  0x1a   :  { %327 = vmatprep.subr.bf16.mxu0 %v326_v60  ;;  %357 = vmatpush3.bf16.msra.mxu1 %v354_v54 }
  0x1b   :  { %359 = vmatprep.subr.bf16.mxu1 %v358_v63 }
  0x1d   :  { %329 = vmatpush1.bf16.msra.mxu0 %v328_v5 }
  0x1e   :  { %331 = vmatprep.subr.bf16.mxu0 %v330_v6  ;;  %361 = vmatpush3.bf16.msra.mxu1 %v358_v63 }
  0x1f   :  { %363 = vmatprep.subr.bf16.mxu1 %v362_v9 }
  0x21   :  { %333 = vmatpush1.bf16.msra.mxu0 %v332_v10 }
  0x22   :  { %365 = vmatpush3.bf16.msra.mxu1 %v362_v9 }
  0x24   :  { %126 = vmatmul.mubr.f32.vlgmr.msra.gmra.mrb[0].mxu0 %v11_v53 }
  0x25   :  { %131 = vmatprep.mubr.f32.mxu0 %v367_v3  ;;  %300 = vmatmul.mubr.f32.vlgmr.msra.gmra.mrb[0].mxu1 %v12_v11 }
  0x28   :  { %132 = vmatmul.mubr.f32.gmra.mrb[2].mxu0 %v12_v11 }
  0xf7   :  { %v127_v12 = vpop.f32.mrb[0].mxu0 }
  0xf8   :  { %v129_v13 = vpop.f32.mrb[1].mxu0  ;;  %v301_v14 = vpop.f32.mrb[0].mxu1 }
  0xf9   :  { %v245_v15 = vpack.c.bf16 %v129_v13, %v127_v12  ;;  %v248_v16 = vpack.c.bf16 %v301_v14, %v301_v14  ;;  %v204_v17 = vpop.f32.mrb[1].mxu1 }
  0xfa   :  { %v246_v18 = vpack.c.bf16 %v204_v17, %v204_v17 }
  0xfb   :  { %233 = vst [vmem:[%s549_s2] sm:$0xff] %v245_v15  ;;  %236 = vst [vmem:[%s549_s2 + $0x14] sm:$0xf] %v248_v16  ;;  %v133_v19 = vpop.f32.mrb[2].mxu0 }
  0xfc   :  { %234 = vst [vmem:[%s549_s2 + $0x8] sm:$0xf] %v246_v18  ;;  %v135_v3 = vpop.f32.mrb[3].mxu0 }
  0xfd   :  { %v247_v20 = vpack.c.bf16 %v135_v3, %v133_v19 }
  0xff   :  { %235 = vst [vmem:[%s549_s2 + $0xc] sm:$0xff] %v247_v20 }

// kernel: attention_forward.3
= control target key start
LH: loop header
LB: loop body
LE: loop exit
PB: predicated region body
PF: predicated region fallthrough
CT: control target
= control target key end

     0   :  { %10 = vsyncpa [#allocation6], 0  ;;  %s1191_s0 = inlined_call_operand.vmem [shape: bf16[2,8,384], index: 0, kind: input, shape index: {}, may-alias: {0,1,2}]   ;;  %s1192_s1 = inlined_call_operand.vmem [shape: bf16[2,8,384], index: 1, kind: input, shape index: {}, may-alias: {0,1,2}]   ;;  %s1193_s2 = inlined_call_operand.vmem [shape: bf16[2,8,384], index: 2, kind: input, shape index: {}, may-alias: {0,1,2}]   ;;  %s1194_s3 = inlined_call_operand.vmem [shape: f32[128,128], index: 3, kind: input, shape index: {}]   ;;  %s1195_s4 = inlined_call_operand.vmem [shape: f32[1,128], index: 4, kind: input, shape index: {}]   ;;  %s1196_s5 = inlined_call_operand.hbm [shape: f32[2,8,128], index: 5, kind: output, shape index: {}]  }
   0x1   :  { %12 = vsyncpa [#allocation6 + $0x1], 0  ;;  %s1010_s18 = smov 0   ;;  %s1012_s19 = smov 0  }
   0x2   :  { %s1014_s20 = smov 0   ;;  %s1016_s21 = smov 0  }
   0x3   :  { %s1018_s22 = smov 0   ;;  %s1020_s23 = smov 0  }
   0x4 LB: > { %s716_s24 = sadd.s32 4294967295, %s972_s23   ;;  %s717_s25 = sadd.s32 4294967294, %s972_s23   ;;  %s972_s23 = sphi %s1020_s23, %s18_s23   ;;  %s968_s22 = sphi %s1018_s22, %s1203_s22   ;;  %s964_s21 = sphi %s1016_s21, %s1202_s21   ;;  %s960_s20 = sphi %s1014_s20, %s1201_s20   ;;  %s956_s19 = sphi %s1012_s19, %s1200_s19   ;;  %s952_s18 = sphi %s1010_s18, %s1199_s18  }
   0x5   : > { %s37_s26 = sadd.s32 1, %s968_s22  ;;  %s172_s27 = sadd.s32 1, %s960_s20 }
   0x6   : > { %p39_p0 = scmp.ge.s32.totalorder %s37_s26, 2  ;;  %p182_p1 = scmp.ne.s32.totalorder %s960_s20, %s956_s19 }
   0x7   : > { %p183_p2 = scmp.eq.s32.totalorder %s716_s24, 1  ;;  %p188_p3 = scmp.ne.s32.totalorder %s956_s19, %s952_s18 }
   0x8   : > { %s1205_s26 = smov (%p39_p0, %s37_s26), 0  ;;  %p189_p5 = scmp.eq.s32.totalorder %s717_s25, 1 }
   0x9   : > { %p1050_p4 = por %p183_p2, %p182_p1  ;;  %s167_s29 = ssub.s32 %s968_s22, %s1205_s26 }
   0xa   : > { %p720_p6 = scmp.ge.s32.totalorder %s972_s23, 1  ;;  %p170_p7 = scmp.eq.s32.totalorder %s167_s29, 0 }
   0xb   : > { %p1057_p8 = por %p189_p5, %p188_p3  ;;  %p251_p9 = scmp.lt.s32.totalorder %s972_s23, 3 }
   0xc   : > { %s1063_s6 = scalar_select %p170_p7, %s960_s20, %s172_s27  }
   0xd   : > { %p252_p10 = pnand %p720_p6, %p251_p9 }
   0xe   : > { %p303_p11 = scmp.lt.s32.totalorder (!%p252_p10), %s964_s21, 1  ;;  %v974_v0 = vmov (!%p252_p10), 0.0   ;;  %vm975_vm0 = vmmov (!%p252_p10), 0   ;;  %vm337_vm1 = vcmask (!%p252_p10), 7168   ;;  %v976_v3 = vmov (!%p252_p10), -1e+30  }
   0xf   : > { %255 = sbr.rel (%p252_p10) target bundleno = 1057 (0x421), region = 40  ;;  %754 = vmatprep.subr.bf16.mxu0 (!%p252_p10), %v974_v0  ;;  %756 = vmatprep.mubr.msk.bf16.mxu0 (!%p252_p10), %vm975_vm0, %v974_v0  ;;  %338 = vst.msk [vmem:[#allocation2] sm:$0xff] (!%p252_p10), %vm337_vm1, %v976_v3  ;;  %339 = vst.msk [vmem:[#allocation3] sm:$0xff] (!%p252_p10), %vm337_vm1, %v974_v0  ;;  %vm385_vm2 = vcmask (!%p252_p10), 64512   ;;  %v977_v9 = vmov (!%p252_p10), 0   ;;  %vm420_vm3 = vcmask (!%p252_p10), 1043456  }
  0x10   : > { %798 = vmatprep.mubr.msk.f32.mxu1 (!%p252_p10), %vm975_vm0, %v974_v0  ;;  %886 = vset.pattern.permute.xlu0 (!%p252_p10), %v977_v9  ;;  %v479_v24 = vld [vmem:[%s1194_s3] sm:$0xff] (!%p252_p10)  ;;  %v480_v25 = vld [vmem:[%s1194_s3 + $0x8] sm:$0xff] (!%p252_p10)  ;;  %v481_v26 = vld [vmem:[%s1194_s3 + $0x10] sm:$0xff] (!%p252_p10)  ;;  %v978_v27 = vmov (!%p252_p10), 0.0|0.0   ;;  %s300_s27 = sand.u32 (!%p252_p10), 1, %s956_s19   ;;  %s730_s9 = sshll.u32 (!%p252_p10), %s964_s21, 7 }
  0x11   : > { %887 = vset.pattern.permute.xlu1 (!%p252_p10), %v977_v9  ;;  %801 = vmatprep.subr.bf16.mxu1 (!%p252_p10), %v978_v27  ;;  %v802_v28 = vpack.c.bf16 (!%p252_p10), %v480_v25, %v479_v24  ;;  %v482_v29 = vld [vmem:[%s1194_s3 + $0x18] sm:$0xff] (!%p252_p10)  ;;  %v483_v31 = vld [vmem:[%s1194_s3 + $0x20] sm:$0xff] (!%p252_p10)  ;;  %v484_v32 = vld [vmem:[%s1194_s3 + $0x28] sm:$0xff] (!%p252_p10)  ;;  %s721_s29 = sshll.u32 (!%p252_p10), %s300_s27, 3  ;;  %s574_s15 = scalar_lea.sflag (!%p252_p10), [#allocation6], %s300_s27 }
  0x12   : > { %v805_v30 = vpack.c.bf16 (!%p252_p10), %v482_v29, %v481_v26  ;;  %v808_v33 = vpack.c.bf16 (!%p252_p10), %v484_v32, %v483_v31  ;;  %v485_v34 = vld [vmem:[%s1194_s3 + $0x30] sm:$0xff] (!%p252_p10)  ;;  %v486_v35 = vld [vmem:[%s1194_s3 + $0x38] sm:$0xff] (!%p252_p10)  ;;  %v487_v37 = vld [vmem:[%s1194_s3 + $0x40] sm:$0xff] (!%p252_p10)  ;;  %s302_s10 = scalar_lea.vmem (!%p252_p10), [#allocation5], %s721_s29 }
  0x13   : > { %803 = vmatpush3.bf16.msra.mxu1 (!%p252_p10), %v802_v28  ;;  %v811_v36 = vpack.c.bf16 (!%p252_p10), %v486_v35, %v485_v34  ;;  %v488_v38 = vld [vmem:[%s1194_s3 + $0x48] sm:$0xff] (!%p252_p10)  ;;  %v489_v40 = vld [vmem:[%s1194_s3 + $0x50] sm:$0xff] (!%p252_p10)  ;;  %v490_v41 = vld [vmem:[%s1194_s3 + $0x58] sm:$0xff] (!%p252_p10) }
  0x14   : > { %804 = vmatprep.subr.bf16.mxu1 (!%p252_p10), %v978_v27  ;;  %v814_v39 = vpack.c.bf16 (!%p252_p10), %v488_v38, %v487_v37  ;;  %v817_v42 = vpack.c.bf16 (!%p252_p10), %v490_v41, %v489_v40  ;;  %v491_v43 = vld [vmem:[%s1194_s3 + $0x60] sm:$0xff] (!%p252_p10)  ;;  %v492_v44 = vld [vmem:[%s1194_s3 + $0x68] sm:$0xff] (!%p252_p10)  ;;  %v493_v46 = vld [vmem:[%s1194_s3 + $0x70] sm:$0xff] (!%p252_p10) }
  0x15   : > { %v820_v45 = vpack.c.bf16 (!%p252_p10), %v492_v44, %v491_v43  ;;  %v494_v47 = vld [vmem:[%s1194_s3 + $0x78] sm:$0xff] (!%p252_p10) }
  0x16   : > { %s304_s7 = scalar_select %p303_p11, %s964_s21, 1  ;;  %v384_v10 = vld [vmem:[#allocation2] sm:$0xff]  ;;  %v823_v48 = vpack.c.bf16 %v494_v47, %v493_v46  ;;  %v401_v49 = vld [vmem:[#allocation3] sm:$0xff] }
  0x17   : > { %806 = vmatpush3.bf16.msra.mxu1 %v805_v30  ;;  %s979_s21 = smov [#allocation5]  }
  0x18   : > { %s1067_s8 = smul.u32 12, %s304_s7  ;;  %807 = vmatprep.subr.bf16.mxu1 %v978_v27 }
  0x1a   : > { %s655_s11 = scalar_lea.vmem %s1192_s1, %s1067_s8  ;;  %s311_s14 = scalar_lea.vmem %s1191_s0, %s1067_s8 }
  0x1b   : > { %v725_v1 = vld [vmem:[%s655_s11 + $0x4] sm:$0xf]  ;;  %v341_v2 = vld [vmem:[%s311_s14] sm:$0xf]  ;;  %s661_s17 = scalar_lea.vmem %s1193_s2, %s1067_s8  ;;  %809 = vmatpush3.bf16.msra.mxu1 %v808_v33  ;;  %s588_s11 = sshll.u32 %s302_s10, 4  ;;  %s1146_s11 = int_to_ptr.vmem [resolvable:$true] %s588_s11 }
  0x1c   : > { %755 = vmatpush3.bf16.xpose.msra.mxu0 %v725_v1  ;;  %v726_v14 = vld [vmem:[%s661_s17 + $0x8] sm:$0xf]  ;;  %810 = vmatprep.subr.bf16.mxu1 %v978_v27  ;;  %s1144_s14 = scalar_lea.hbm %s1196_s5, %s730_s9  ;;  %s894_s16 = scalar_lea.vmem %s1146_s11, 128 }
  0x1d   : > { %760 = vmatprep.subr.bf16.mxu0 %v974_v0  ;;  %v422_v15 = vsel %vm420_vm3, %v726_v14, 0  ;;  %p895_p12 = scmp.ne.s32.totalorder %s1146_s11, %s894_s16  ;;  %s898_s17 = sshll.u32 %s979_s21, 4  ;;  %s899_s17 = int_to_ptr.vmem [resolvable:$false] %s898_s17 }
  0x1e   : > { %s900_s24 = scalar_lea.vmem %s899_s17, 256  ;;  %p901_p1 = scmp.lt.s32.totalorder %s1146_s11, %s899_s17 }
  0x1f   : > { %812 = vmatpush3.bf16.msra.mxu1 %v811_v36  ;;  %p896_p13 = pnand %p895_p12, %p1050_p4  ;;  %p902_p2 = scmp.lt.s32.totalorder %s900_s24, %s894_s16 }
  0x20   : > { %813 = vmatprep.subr.bf16.mxu1 %v978_v27 }
  0x21   : > { %p897_p0 = pneg %p896_p13  ;;  %p903_p3 = por %p902_p2, %p901_p1 }
  0x23   : > { %757 = vmatmul.mubr.bf16.vlgmr.msra.gmra.mrb[0].mxu0 %v341_v2  ;;  %815 = vmatpush3.bf16.msra.mxu1 %v814_v39  ;;  %p904_p5 = pnand %p903_p3, %p897_p0 }
  0x24   : > { %762 = vmatprep.mubr.msk.bf16.mxu0 %vm975_vm0, %v974_v0  ;;  %761 = vmatpush3.bf16.msra.mxu0 %v422_v15  ;;  %v728_v0 = vld [vmem:[%s1195_s4] ss:$0 sm:$0xff] }
  0x25   : > { %816 = vmatprep.subr.bf16.mxu1 %v978_v27 }
  0x27   : > { %818 = vmatpush3.bf16.msra.mxu1 %v817_v42 }
  0x28   : > { %819 = vmatprep.subr.bf16.mxu1 %v978_v27 }
  0x2b   : > { %821 = vmatpush3.bf16.msra.mxu1 %v820_v45 }
  0x2c   : > { %822 = vmatprep.subr.bf16.mxu1 %v978_v27 }
  0x2f   : > { %824 = vmatpush3.bf16.msra.mxu1 %v823_v48 }
  0xf6   : > { %v378_v4 = vpop.f32.mrb[0].mxu0 }
  0xf7   : > { %v758_v5 = vpop.f32.mrb[1].mxu0  ;;  %v386_v6 = vsel %vm385_vm2, %v378_v4, -inf }
  0xf8   : > { %387 = vmax.xlane.f32.xlu0 %v386_v6  ;;  %v381_v7 = vpop.f32.mrb[2].mxu0 }
  0xf9   : > { %v759_v8 = vpop.f32.mrb[3].mxu0 }
 0x185   : > { %v388_v11 = vpop.xlane.xlu0 %387 }
 0x186   : > { %v389_v12 = vmax.f32 %v384_v10, %v388_v11 }
 0x188   : > { %v390_v13 = vsub.f32 %v384_v10, %v389_v12  ;;  %466 = vst.msk [vmem:[#allocation2] sm:$0xff] %vm337_vm1, %v389_v12  ;;  %395 = vperm.xlu0 %886, %v389_v12  }
 0x18a   : > { %v391_v22 = vmul.f32 1.442695, %v390_v13 }
 0x207   : > { %v396_v16 = vpop.permute.xlu0 %395 }
 0x208   : > { %v398_v17 = vsub.f32 %v378_v4, %v396_v16 }
 0x20a   : > { %v399_v18 = vmul.f32 1.442695, %v398_v17 }
 0x20c   : > { %888 = vpow2.f32 %v399_v18 }
 0x20d   : > { %890 = vpow2.f32 %v391_v22 }
 0x216   : > { %v889_v19 = vpop.eup %888 }
 0x217   : > { %v403_v20 = vsel %vm385_vm2, %v889_v19, 0.0  ;;  %v416_v21 = vpack.c.bf16 %v889_v19, %v889_v19  ;;  %v891_v23 = vpop.eup %890 }
 0x218   : > { %404 = vadd.xlane.f32.xlu1 %v403_v20  ;;  %v402_v50 = vmul.f32 %v891_v23, %v401_v49 }
 0x219   : > { %763 = vmatmul.mubr.msk.bf16.vlgmr.msra.gmra.mrb[4].mxu0 %vm385_vm2, %v416_v21 }
 0x229   : > { %412 = vperm.xlu1 %887, %v891_v23  }
 0x2a5   : > { %v405_v51 = vpop.xlane.xlu1 %404 }
 0x2a6   : > { %v406_v52 = vadd.f32 %v405_v51, %v402_v50 }
 0x2a8   : > { %408 = vst.msk [vmem:[#allocation3] sm:$0xff] %vm337_vm1, %v406_v52 }
 0x2a9   : > { %v413_v59 = vpop.permute.xlu1 %412 }
 0x2aa   : > { %v415_v60 = vmul.f32 0.0, %v413_v59 }
 0x2af   : > { %v471_v53 = vld [vmem:[#allocation3] sm:$0xff] }
 0x2b0   : > { %892 = vrcp.f32 %v471_v53 }
 0x2ba   : > { %v893_v54 = vpop.eup %892 }
 0x2bb   : > { %475 = vperm.xlu1 %887, %v893_v54  }
 0x2ec   : > { %v458_v55 = vpop.f32.mrb[4].mxu0 }
 0x2ed   : > { %v764_v56 = vpop.f32.mrb[5].mxu0  ;;  %v464_v61 = vadd.f32 %v458_v55, %v415_v60 }
 0x2ee   : > { %v461_v57 = vpop.f32.mrb[6].mxu0 }
 0x2ef   : > { %v765_v58 = vpop.f32.mrb[7].mxu0 }
 0x33a   : > { %v476_v62 = vpop.permute.xlu1 %475 }
 0x33b   : > { %v478_v63 = vmul.f32 %v476_v62, %v464_v61 }
 0x33d   : > { %799 = vmatmul.mubr.f32.vlgmr.msra.gmra.mrb[0].mxu1 %v478_v63 }
 0x410   : > { %v568_v1 = vpop.f32.mrb[0].mxu1 }
 0x411   : > { %v569_v2 = vadd.f32 %v728_v0, %v568_v1  ;;  %v800_v3 = vpop.f32.mrb[1].mxu1 }
 0x413   : > { %572 = vst [vmem:[%s302_s10] sm:$0xff] %v569_v2 }
 0x414   : > { %907 = shalt.err (!%p904_p5)
}
 0x415   : > { %s908_s25 = scalar_lea.hbm %s1144_s14, 128  ;;  %s912_s7 = scalar_lea.hbm %s1196_s5, 256 }
 0x416   : > { %p909_p6 = scmp.ne.s32.totalorder %s1144_s14, %s908_s25  ;;  %p913_p10 = scmp.lt.u32.totalorder %s1144_s14, %s1196_s5 }
 0x417   : > { %p914_p11 = scmp.lt.u32.totalorder %s912_s7, %s908_s25  ;;  %p916_p13 = scmp.lt.u32.totalorder %s908_s25, %s1144_s14 }
 0x418   : > { %p910_p7 = pnand %p909_p6, %p1050_p4 }
 0x419   : > { %p915_p12 = por %p914_p11, %p913_p10 }
 0x41a   : > { %p911_p9 = pneg %p910_p7 }
 0x41b   : > { %p917_p0 = por %p916_p13, %p915_p12 }
 0x41d   : > { %p918_p1 = pnand %p917_p0, %p911_p9 }
 0x41f   : > { %921 = shalt.err (!%p918_p1)
}
 0x420   : > { %826 = dma.vmem_to_hbm [thread:$0]  (%p1050_p4), %s1146_s11, 128, %s1144_s14, %s574_s15  }
 0x421 PF: > { %p832_p2 = scmp.ge.s32.totalorder %s972_s23, 2  ;;  %s600_s10 = sand.u32 1, %s952_s18  }
 0x422   : > { %s601_s12 = scalar_lea.sflag [#allocation6], %s600_s10 }
 0x423   : > { %p829_p3 = pnand %p832_p2, %p1057_p8 }
 0x425   : > { %947 = dma.done.wait (!%p829_p3), %s601_s12, 128  }
 0x426   : > { %949 = vsyncadd (!%p829_p3), %s601_s12, 4294967168  ;;  %s18_s23 = sadd.s32 1, %s972_s23   ;;  %s1199_s18 = smov %s956_s19 }
 0x427   : > { %p15_p5 = scmp.ge.s32.totalorder %s18_s23, 4   ;;  %s1200_s19 = smov %s960_s20 }
 0x428   : > { %s1201_s20 = smov %s1063_s6  ;;  %s1202_s21 = smov %s968_s22 }
 0x429   : > { %s1203_s22 = smov %s1205_s26  ;;  %17 = sbr.rel (!%p15_p5) target bundleno = 4 (0x4), region = 89 }
 0x430   :  { %606 = vsyncpa [#allocation6], 1 }
 0x431   :  { %608 = vsyncpa [#allocation6 + $0x1], 1 }

</bundles_post_ra>
